<compile_context>
chip_gen: v6e
topology: v6e:2x2x1
jax: 0.10.0
libtpu: 0.0.40
codegen_flags: <defaults>
</compile_context>

<pallas_src>
import functools

import jax
import jax.numpy as jnp
from jax.experimental import pallas as pl
from jax.experimental.pallas import tpu as pltpu


def _round_up(x, m):
    return ((x + m - 1) // m) * m


def _vmem_capacity_bytes():
    """Physical per-core VMEM, with a conservative fallback (v7x: 64 MiB)."""
    try:
        info = pltpu.get_tpu_info()
        cap = getattr(info, "vmem_capacity_bytes", None)
        if cap:
            return int(cap)
    except Exception:
        pass
    return 64 * 1024 * 1024


def _select_tiles(d_embed, d_vocab, vmem_cap, tm_target=256):
    """Pick (tm_max, tv, vmem_limit_bytes) from the per-generation VMEM budget.

    Double-buffered working set:
        2 * (tm*D*2 [h bf16] + D*tv*2 [w bf16] + tm*tv*4 [out f32]) bytes.
    ~70% of physical VMEM is given to the pipeline; the rest is headroom.
    At D=4096 this yields tv=4096 on v6e/v5e (128 MiB) and tv=2048 on v7x
    (64 MiB), matching the per-generation tuning guidance.
    """
    budget = int(vmem_cap * 0.70)
    tm = tm_target
    tv = 128
    for cand in (4096, 2048, 1024, 512, 256, 128):
        need = 2 * (tm * d_embed * 2 + d_embed * cand * 2 + tm * cand * 4)
        if need <= budget:
            tv = cand
            break
    # Never tile wider than the (128-aligned) vocab itself.
    tv = min(tv, _round_up(max(d_vocab, 1), 128))
    need = 2 * (tm * d_embed * 2 + d_embed * tv * 2 + tm * tv * 4)
    vmem_limit = min(max(int(need * 3) // 2, 32 * 1024 * 1024), vmem_cap)
    return tm, tv, vmem_limit


# ----------------------------- Pallas kernel --------------------------------
def _lm_head_kernel(h_ref, w_ref, out_ref):
    # h_ref: (TM, D) bf16, w_ref: (D, TV) bf16, out_ref: (TM, TV) f32
    out_ref[...] = jnp.dot(h_ref[...], w_ref[...],
                           preferred_element_type=jnp.float32)  # MXU, f32 acc


def _logits_pallas(h, w, *, tm_max, tv, vmem_limit_bytes):
    """h: [N, D] bf16 activations; w: [D, V_pad] bf16 tied lm head (V_pad % tv
    == 0, padded columns are zero) -> [N, V_pad] f32 logits."""
    n, d = h.shape
    v_pad = w.shape[1]
    assert v_pad % tv == 0, (v_pad, tv)

    # Row tile: multiple of 16 (bf16 sublane packing). Decode-sized batches
    # get a single row tile; prefill uses tm_max-row tiles.
    n_pad16 = _round_up(max(n, 16), 16)
    if n_pad16 <= tm_max:
        tm, n_pad = n_pad16, n_pad16
    else:
        tm, n_pad = tm_max, _round_up(n, tm_max)
    if n_pad != n:
        h = jnp.pad(h, ((0, n_pad - n), (0, 0)))

    # Weight tiles on the outer axis, row tiles inner -> each (D, tv) weight
    # tile is DMA'd exactly once (index_map constant across the inner axis).
    grid = (v_pad // tv, n_pad // tm)

    out = pl.pallas_call(
        _lm_head_kernel,
        out_shape=jax.ShapeDtypeStruct((n_pad, v_pad), jnp.float32),
        grid_spec=pltpu.PrefetchScalarGridSpec(
            num_scalar_prefetch=0,
            grid=grid,
            in_specs=[
                pl.BlockSpec((tm, d), lambda vi, ni: (ni, 0)),   # activations
                pl.BlockSpec((d, tv), lambda vi, ni: (0, vi)),   # lm-head tile
            ],
            out_specs=pl.BlockSpec((tm, tv), lambda vi, ni: (ni, vi)),
        ),
        compiler_params=pltpu.CompilerParams(
            dimension_semantics=("parallel", "parallel"),
            vmem_limit_bytes=vmem_limit_bytes),
    )(h, w)
    if n_pad != n:
        out = out[:n]          # only row padding is ever sliced off
    return out                  # [N, V_pad]; padded vocab columns are zero


# ------------------------------ Model wrapper --------------------------------
class BaseModelPallas:
    """Minimal GPT-style forward matching the BaseModel contract."""

    def __init__(self, d_vocab, d_embed, block_size, key):
        self.d_vocab = d_vocab
        self.d_embed = d_embed
        self.block_size = block_size
        k_wte, k_wpe = jax.random.split(key)
        # Deterministic synthetic parameters (no checkpoint loading).
        self.wte = 0.02 * jax.random.normal(k_wte, (d_vocab, d_embed),
                                            dtype=jnp.float32)
        self.wpe = 0.02 * jax.random.normal(k_wpe, (block_size, d_embed),
                                            dtype=jnp.float32)

        # Per-generation tile selection + explicit scoped-VMEM limit.
        vmem_cap = _vmem_capacity_bytes()
        self.tm_max, self.tv, self.vmem_limit = _select_tiles(
            d_embed, d_vocab, vmem_cap)

        # Cached, vocab-padded, bf16 tied lm-head weight [D, V_pad]: built once
        # here so forward() never re-transposes / re-casts / re-pads it.
        self.d_vocab_padded = _round_up(d_vocab, self.tv)
        w_lm = self.wte.T.astype(jnp.bfloat16)
        if self.d_vocab_padded != d_vocab:
            w_lm = jnp.pad(w_lm, ((0, 0), (0, self.d_vocab_padded - d_vocab)))
        self.w_lm = w_lm

    def get_num_params(self, include_embeddings=True):
        n = self.wte.size + self.wpe.size
        if not include_embeddings:
            n -= self.wte.size
        return n

    @functools.partial(jax.jit, static_argnums=0)
    def forward(self, x):
        # x: [B, T] int32 token ids
        b, t = x.shape
        # Embedding gather + positional add fused by XLA; the positional table
        # is broadcast over the batch (no [B*T, D] positional slab).
        tok_emb = jnp.take(self.wte, x.reshape(-1), axis=0)          # [B*T, D]
        pos_emb = jnp.take(self.wpe, jnp.arange(t, dtype=jnp.int32),
                           axis=0)                                   # [T, D]
        h = tok_emb.reshape(b, t, self.d_embed) + pos_emb[None, :, :]
        h = h.reshape(b * t, self.d_embed).astype(jnp.bfloat16)
        logits_flat = _logits_pallas(h, self.w_lm,
                                     tm_max=self.tm_max, tv=self.tv,
                                     vmem_limit_bytes=self.vmem_limit)
        if self.d_vocab_padded != self.d_vocab:
            # Only needed when d_vocab is not tile-aligned (GPT-2-style 50304
            # vocabularies skip this copy entirely).
            logits_flat = logits_flat[:, :self.d_vocab]
        logits = logits_flat.reshape(b, t, self.d_vocab)              # [B,T,V]
        return logits, None

    def __call__(self, x):
        return self.forward(x)


# ---------------------------------- main -------------------------------------
if __name__ == "__main__":
    key = jax.random.PRNGKey(0)
    k_params, k_tokens, k_h, k_w = jax.random.split(key, 4)

    # ---- 1) Model forward at a small toy config -----------------------------
    B, T, D, V = 2, 8, 32, 64   # batch, seq, d_embed, d_vocab
    model = BaseModelPallas(d_vocab=V, d_embed=D, block_size=T, key=k_params)

    x = jax.random.randint(k_tokens, (B, T), 0, V, dtype=jnp.int32)
    logits, _ = model(x)
    logits = jax.block_until_ready(logits)

    tok = jnp.take(model.wte, x.reshape(-1), axis=0).reshape(B, T, D)
    pos = jnp.take(model.wpe, jnp.arange(T, dtype=jnp.int32), axis=0)
    h_ref = (tok + pos[None, :, :]).reshape(B * T, D).astype(jnp.bfloat16)
    ref = jnp.dot(h_ref, model.wte.T.astype(jnp.bfloat16),
                  preferred_element_type=jnp.float32).reshape(B, T, V)

    assert logits.shape == (B, T, V)
    assert jnp.allclose(logits, ref, atol=1e-3, rtol=1e-3), \
        float(jnp.max(jnp.abs(logits - ref)))

    # ---- 2) Multi-tile / padded-row exercise of the kernel itself -----------
    N2, D2, VP2 = 40, 32, 384          # 3x3 grid with tm=16, tv=128; row pad 40->48
    h2 = jax.random.normal(k_h, (N2, D2), dtype=jnp.float32).astype(jnp.bfloat16)
    w2 = jax.random.normal(k_w, (D2, VP2), dtype=jnp.float32).astype(jnp.bfloat16)
    out2 = _logits_pallas(h2, w2, tm_max=16, tv=128,
                          vmem_limit_bytes=32 * 1024 * 1024)
    out2 = jax.block_until_ready(out2)
    ref2 = jnp.dot(h2, w2, preferred_element_type=jnp.float32)
    assert out2.shape == (N2, VP2)
    assert jnp.allclose(out2, ref2, atol=1e-3, rtol=1e-3), \
        float(jnp.max(jnp.abs(out2 - ref2)))

    print("KERNEL_OK")
</pallas_src>

<mosaic_0001>
module attributes {stable_mosaic.version = 11 : i64} {
  func.func @_lm_head_kernel(%arg0: i32, %arg1: i32, %arg2: memref<16x32xbf16, #tpu.memory_space<vmem>>, %arg3: memref<32x128xbf16, #tpu.memory_space<vmem>>, %arg4: memref<16x128xf32, #tpu.memory_space<vmem>>) attributes {dimension_semantics = [#tpu.dimension_semantics<parallel>, #tpu.dimension_semantics<parallel>], iteration_bounds = array<i64: 1, 1>, scalar_prefetch = 0 : i64, scratch_operands = 0 : i64, tpu.core_type = #tpu.core_type<tc>, window_params = [{transform_indices = @transform_0, window_bounds = array<i64: 16, 32>}, {transform_indices = @transform_1, window_bounds = array<i64: 32, 128>}, {transform_indices = @transform_2, window_bounds = array<i64: 16, 128>}]} {
    %c0 = arith.constant 0 : index
    %c0_0 = arith.constant 0 : index
    %0 = vector.load %arg2[%c0, %c0_0] : memref<16x32xbf16, #tpu.memory_space<vmem>>, vector<16x32xbf16>
    %c0_1 = arith.constant 0 : index
    %c0_2 = arith.constant 0 : index
    %1 = vector.load %arg3[%c0_1, %c0_2] : memref<32x128xbf16, #tpu.memory_space<vmem>>, vector<32x128xbf16>
    %cst = arith.constant dense<0.000000e+00> : vector<16x128xf32>
    %2 = tpu.matmul %0, %1, %cst {dimension_numbers = #tpu.dot_dimension_numbers<[1], [0], [0], [1], [0, 0, 1, 1], [], []>} : vector<16x32xbf16>, vector<32x128xbf16>, vector<16x128xf32> -> vector<16x128xf32>
    %c0_3 = arith.constant 0 : index
    %c0_4 = arith.constant 0 : index
    %3 = vector.load %arg4[%c0_3, %c0_4] : memref<16x128xf32, #tpu.memory_space<vmem>>, vector<16x128xf32>
    tpu.vector_store %arg4[%c0_3, %c0_4], %2 {strides = array<i32>} : memref<16x128xf32, #tpu.memory_space<vmem>>, vector<16x128xf32>,
    return
  }
  func.func @transform_0(%arg0: i32, %arg1: i32) -> (i32, i32) {
    %c0_i32 = arith.constant 0 : i32
    %c0_i32_0 = arith.constant 0 : i32
    return %arg1, %c0_i32 : i32, i32
  }
  func.func @transform_1(%arg0: i32, %arg1: i32) -> (i32, i32) {
    %c0_i32 = arith.constant 0 : i32
    %c0_i32_0 = arith.constant 0 : i32
    return %c0_i32, %arg0 : i32, i32
  }
  func.func @transform_2(%arg0: i32, %arg1: i32) -> (i32, i32) {
    %c0_i32 = arith.constant 0 : i32
    return %arg1, %arg0 : i32, i32
  }
}

</mosaic_0001>

<bundles_post_ra>
// kernel: forward.1
= control target key start
LH: loop header
LB: loop body
LE: loop exit
PB: predicated region body
PF: predicated region fallthrough
CT: control target
= control target key end

     0   :  { %v106_v0 = vmov 0.0   ;;  %vm107_vm0 = vmmov 0   ;;  %vm35_vm1 = vcmask 261120   ;;  %s138_s1 = inlined_call_operand.vmem [shape: bf16[32,128], index: 1, kind: input, shape index: {}]   ;;  %s139_s0 = inlined_call_operand.vmem [shape: bf16[16,32], index: 0, kind: input, shape index: {}]   ;;  %s140_s2 = inlined_call_operand.vmem [shape: f32[16,128], index: 2, kind: output, shape index: {}]  }
   0x1   :  { %93 = vmatprep.subr.bf16.mxu0 %v106_v0  ;;  %v103_v1 = vld [vmem:[%s138_s1 + $0x8] sm:$0xff]   ;;  %97 = vmatprep.mubr.msk.bf16.mxu0 %vm107_vm0, %v106_v0  ;;  %v104_v2 = vld [vmem:[%s138_s1] sm:$0xff]  }
   0x2   :  { %94 = vmatpush3.bf16.msra.mxu0 %v103_v1  ;;  %v105_v3 = vld [vmem:[%s139_s0] sm:$0xff]  }
   0x3   :  { %95 = vmatprep.subr.bf16.mxu0 %v106_v0 }
   0x6   :  { %96 = vmatpush3.bf16.msra.mxu0 %v104_v2 }
   0x9   :  { %98 = vmatmul.mubr.msk.bf16.vlgmr.msra.gmra.mxu0 %vm35_vm1, %v105_v3 }
  0xc9   :  { %v73_v4 = vpop.f32.mrf.mxu0 }
  0xca   :  { %80 = vst [vmem:[%s140_s2] sm:$0xff] %v73_v4 }
  0xcb   :  { %v99_v5 = vpop.f32.mrf.mxu0 }
  0xcd   :  { %v76_v6 = vpop.f32.mrf.mxu0 }
  0xce   :  { %81 = vst [vmem:[%s140_s2 + $0x8] sm:$0xff] %v76_v6 }
  0xcf   :  { %v100_v7 = vpop.f32.mrf.mxu0 }

</bundles_post_ra>
